<compile_context>
chip_gen: v7x
topology: tpu7x:2x2x1
jax: 0.10.0
libtpu: 0.0.40
codegen_flags: <defaults>
</compile_context>

<pallas_src>
import functools

import jax
import jax.numpy as jnp
from jax.experimental import pallas as pl
from jax.experimental.pallas import tpu as pltpu


ALPHA = 1.0
GAMMA = 2.0
REDUCTION = "mean"   # matches the PyTorch default


def _round_up(x, m):
    return ((x + m - 1) // m) * m


def _vmem_capacity_bytes():
    """Physical VMEM per TensorCore; conservative fallback = 64 MiB (v7x)."""
    try:
        cap = int(pltpu.get_tpu_info().vmem_capacity_bytes)
        if cap > 0:
            return cap
    except Exception:
        pass
    return 64 * 1024 * 1024


def _choose_tile_n(n, c, in_dtype, vmem_cap, max_tile_n=None):
    """Largest batch tile that fits the generation-aware VMEM budget."""
    in_bytes = int(jnp.dtype(in_dtype).itemsize)
    # Sublane packing: f32 -> 8 rows, bf16 -> 16, int8/fp8 -> 32.
    align = 8 * max(1, 4 // max(in_bytes, 1))
    c_pad = _round_up(c, 128)                      # lane-padded class width

    # ~75% of physical VMEM: 48 MiB on v7x (64 MiB/TC), ~96 MiB on v5e/v6e.
    budget = (vmem_cap * 3) // 4

    # Live VMEM bytes per tile row (real dtypes, lane-padded widths):
    #   2x double-buffered logits input block      : 2 * c_pad * in_bytes
    #   2x double-buffered targets block (tn, 1)   : 2 * 128 * 4  (128-lane pad)
    #   ~3 tile-sized f32 temporaries + i32 iota + slack : 5 * c_pad * 4
    vmem_row = 2 * c_pad * in_bytes + 2 * 128 * 4 + 5 * c_pad * 4
    rows_vmem = max(align, budget // vmem_row)

    # Cap HBM bytes per grid step at ~16 MiB: >= ~5 us of DMA even at v7x's
    # ~3.2 TB/s, amortizing the ~0.35 us per-step overhead while keeping
    # several grid steps in flight.
    hbm_row = c * in_bytes + 4
    rows_hbm = max(align, (16 * 1024 * 1024) // hbm_row)

    tile = min(rows_vmem, rows_hbm, n)
    # Keep >= 2 grid steps when the batch allows it (v7x: 2 TCs per chip and
    # the grid axis is "parallel").
    tile = min(tile, _round_up(pl.cdiv(n, 2), align))
    if max_tile_n is not None:
        tile = min(tile, int(max_tile_n))
    if tile >= n:
        return int(n)                              # single full-array tile
    tile = max(align, (tile // align) * align)
    return int(min(tile, n))


def _focal_loss_tile_kernel(logits_ref, targets_ref, partial_ref, *,
                            n_total, tile_n, alpha, gamma):
    """One batch tile: per-row focal CE, masked partial sum -> dense block."""
    i = pl.program_id(0)

    x = logits_ref[...].astype(jnp.float32)          # (tile_n, C) f32
    t = targets_ref[...].astype(jnp.int32)           # (tile_n, 1) i32
    tn, c = x.shape

    # Mask rows past the true batch size (last tile may read OOB garbage).
    row = jax.lax.broadcasted_iota(jnp.int32, (tn, 1), 0) + i * tile_n
    valid = row < n_total                             # (tile_n, 1) bool

    # --- cross_entropy(reduction='none'), log-softmax form with a single
    #     `shifted` temporary reused for both exp-sum and target gather ---
    m = jnp.max(x, axis=-1, keepdims=True)                                    # (tn,1)
    shifted = x - m                                                           # (tn,C)
    sumexp = jnp.sum(jnp.exp(shifted), axis=-1, keepdims=True)                # (tn,1)
    col = jax.lax.broadcasted_iota(jnp.int32, (tn, c), 1)                     # (tn,C)
    tgt_shifted = jnp.sum(jnp.where(col == t, shifted, 0.0),
                          axis=-1, keepdims=True)                             # (tn,1)
    ce = jnp.log(sumexp) - tgt_shifted                                        # (tn,1)

    # --- focal weighting ---
    # pt = exp(-ce); exact reciprocal (approx EUP recip would cost accuracy
    # in (1 - pt)**2 near pt -> 1, and the kernel is DMA-bound anyway).
    pt = jnp.exp(tgt_shifted) * pl.reciprocal(sumexp, approx=False)
    base = jnp.maximum(1.0 - pt, 0.0)                 # clamp tiny negatives
    if gamma == 2.0:
        w = base * base                               # VPU mul, no pow
    elif gamma == 1.0:
        w = base
    elif gamma == 0.0:
        w = jnp.ones_like(base)
    else:
        w = base ** gamma
    focal = alpha * w * ce
    # Mask BEFORE the reduction: padded rows may hold NaN/Inf garbage.
    focal = jnp.where(valid, focal, 0.0)

    partial = jnp.sum(focal)
    # Dense (1, 8, 128) block: partial sum at [0, 0, 0], exact zeros elsewhere,
    # so the wrapper can do a single dense jnp.sum over the whole output.
    sub = jax.lax.broadcasted_iota(jnp.int32, partial_ref.shape, 1)
    lane = jax.lax.broadcasted_iota(jnp.int32, partial_ref.shape, 2)
    partial_ref[...] = jnp.where((sub == 0) & (lane == 0),
                                 partial, 0.0).astype(jnp.float32)


def focal_loss(logits, targets, *, alpha=ALPHA, gamma=GAMMA,
               reduction=REDUCTION, max_tile_n=None):
    """logits: (N, C) float32/bf16; targets: (N,) int. Returns scalar f32."""
    n, c = logits.shape
    vmem_cap = _vmem_capacity_bytes()
    tile_n = _choose_tile_n(n, c, logits.dtype, vmem_cap, max_tile_n=max_tile_n)
    num_tiles = pl.cdiv(n, tile_n)

    targets2d = targets.astype(jnp.int32).reshape(n, 1)

    kernel = functools.partial(
        _focal_loss_tile_kernel,
        n_total=n, tile_n=tile_n, alpha=float(alpha), gamma=float(gamma),
    )

    # ~90% of physical VMEM: lifts v5e/v6e scoped defaults, leaves headroom
    # over the ~75% tile budget on v7x's 64 MiB.
    vmem_limit = int(vmem_cap * 9) // 10

    partials = pl.pallas_call(
        kernel,
        out_shape=jax.ShapeDtypeStruct((num_tiles, 8, 128), jnp.float32),
        grid=(num_tiles,),
        in_specs=[
            pl.BlockSpec((tile_n, c), lambda i: (i, 0)),   # logits tile
            pl.BlockSpec((tile_n, 1), lambda i: (i, 0)),   # targets tile
        ],
        out_specs=pl.BlockSpec((1, 8, 128), lambda i: (i, 0, 0)),
        compiler_params=pltpu.CompilerParams(
            dimension_semantics=("parallel",),
            vmem_limit_bytes=vmem_limit,
        ),
    )(logits, targets2d)

    total = jnp.sum(partials)          # dense reduce; off-[0,0,0] entries are exact zeros
    if reduction == "mean":
        return total / jnp.float32(n)
    return total


def _focal_loss_ref(logits, targets, *, alpha=ALPHA, gamma=GAMMA, reduction=REDUCTION):
    """Pure-JAX reference (matches torch FocalLoss forward)."""
    x = logits.astype(jnp.float32)
    lse = jax.nn.logsumexp(x, axis=-1)
    tgt = jnp.take_along_axis(x, targets[:, None].astype(jnp.int32), axis=-1)[:, 0]
    ce = lse - tgt
    pt = jnp.exp(-ce)
    fl = alpha * (1.0 - pt) ** gamma * ce
    return jnp.mean(fl) if reduction == "mean" else jnp.sum(fl)


if __name__ == "__main__":
    key = jax.random.PRNGKey(0)
    k1, k2, k3, k4, k5, k6 = jax.random.split(key, 6)

    # Test 1: small shape, single tile (batch=8, classes=32).
    N1, C1 = 8, 32
    logits1 = jax.random.normal(k1, (N1, C1), dtype=jnp.float32)
    targets1 = jax.random.randint(k2, (N1,), 0, C1, dtype=jnp.int32)
    out1 = jax.block_until_ready(focal_loss(logits1, targets1))
    ref1 = _focal_loss_ref(logits1, targets1)
    assert jnp.allclose(out1, ref1, rtol=1e-5, atol=1e-5), (out1, ref1)

    # Test 2: multi-tile grid + padded-row masking (N not a multiple of the tile).
    N2, C2 = 200, 40
    logits2 = jax.random.normal(k3, (N2, C2), dtype=jnp.float32)
    targets2 = jax.random.randint(k4, (N2,), 0, C2, dtype=jnp.int32)
    out2 = jax.block_until_ready(focal_loss(logits2, targets2, max_tile_n=64))
    ref2 = _focal_loss_ref(logits2, targets2)
    assert jnp.allclose(out2, ref2, rtol=1e-5, atol=1e-5), (out2, ref2)

    # Test 3: bf16 logits (16-row sublane-aligned tiles, in-kernel upcast).
    N3, C3 = 48, 40
    logits3 = jax.random.normal(k5, (N3, C3), dtype=jnp.float32).astype(jnp.bfloat16)
    targets3 = jax.random.randint(k6, (N3,), 0, C3, dtype=jnp.int32)
    out3 = jax.block_until_ready(focal_loss(logits3, targets3))
    ref3 = _focal_loss_ref(logits3, targets3)
    assert jnp.allclose(out3, ref3, rtol=1e-5, atol=1e-5), (out3, ref3)

    print("KERNEL_OK")
</pallas_src>

<mosaic_0001>
module attributes {stable_mosaic.version = 11 : i64} {
  func.func @_focal_loss_tile_kernel(%arg0: i32, %arg1: memref<8x32xf32, #tpu.memory_space<vmem>>, %arg2: memref<8x1xi32, #tpu.memory_space<vmem>>, %arg3: memref<1x8x128xf32, #tpu.memory_space<vmem>>) attributes {dimension_semantics = [#tpu.dimension_semantics<parallel>], iteration_bounds = array<i64: 1>, scalar_prefetch = 0 : i64, scratch_operands = 0 : i64, tpu.core_type = #tpu.core_type<tc>, window_params = [{transform_indices = @transform_0, window_bounds = array<i64: 8, 32>}, {transform_indices = @transform_1, window_bounds = array<i64: 8, 1>}, {transform_indices = @transform_2, window_bounds = array<i64: 1, 8, 128>}]} {
    %c0 = arith.constant 0 : index
    %c0_0 = arith.constant 0 : index
    %0 = vector.load %arg1[%c0, %c0_0] : memref<8x32xf32, #tpu.memory_space<vmem>>, vector<8x32xf32>
    %c0_1 = arith.constant 0 : index
    %c0_2 = arith.constant 0 : index
    %1 = vector.load %arg2[%c0_1, %c0_2] : memref<8x1xi32, #tpu.memory_space<vmem>>, vector<8x1xi32>
    %2 = tpu.iota {dimensions = array<i32: 0>} : vector<8x1xi32>
    %c8_i32 = arith.constant 8 : i32
    %3 = arith.muli %arg0, %c8_i32 : i32
    %4 = vector.broadcast %3 : i32 to vector<8x1xi32>
    %5 = arith.addi %2, %4 : vector<8x1xi32>
    %c8_i32_3 = arith.constant 8 : i32
    %6 = vector.broadcast %c8_i32_3 : i32 to vector<8x1xi32>
    %7 = arith.cmpi slt, %5, %6 : vector<8x1xi32>
    %cst = arith.constant dense<0xFF800000> : vector<8xf32>
    %8 = vector.multi_reduction <maximumf>, %0, %cst [1] : vector<8x32xf32> to vector<8xf32>
    %9 = vector.shape_cast %8 : vector<8xf32> to vector<8x1xf32>
    %10 = vector.broadcast %9 : vector<8x1xf32> to vector<8x32xf32>
    %11 = arith.subf %0, %10 : vector<8x32xf32>
    %12 = math.exp %11 : vector<8x32xf32>
    %cst_4 = arith.constant dense<0.000000e+00> : vector<8xf32>
    %13 = vector.multi_reduction <add>, %12, %cst_4 [1] : vector<8x32xf32> to vector<8xf32>
    %14 = vector.shape_cast %13 : vector<8xf32> to vector<8x1xf32>
    %15 = tpu.iota {dimensions = array<i32: 1>} : vector<8x32xi32>
    %16 = vector.broadcast %1 : vector<8x1xi32> to vector<8x32xi32>
    %17 = arith.cmpi eq, %15, %16 : vector<8x32xi32>
    %cst_5 = arith.constant 0.000000e+00 : f32
    %18 = vector.broadcast %cst_5 : f32 to vector<8x32xf32>
    %19 = arith.select %17, %11, %18 : vector<8x32xi1>, vector<8x32xf32>
    %cst_6 = arith.constant dense<0.000000e+00> : vector<8xf32>
    %20 = vector.multi_reduction <add>, %19, %cst_6 [1] : vector<8x32xf32> to vector<8xf32>
    %21 = vector.shape_cast %20 : vector<8xf32> to vector<8x1xf32>
    %22 = math.log %14 : vector<8x1xf32>
    %23 = arith.subf %22, %21 : vector<8x1xf32>
    %24 = math.exp %21 : vector<8x1xf32>
    %25 = tpu.reciprocal %14 : vector<8x1xf32> -> vector<8x1xf32>
    %26 = arith.mulf %24, %25 : vector<8x1xf32>
    %cst_7 = arith.constant 1.000000e+00 : f32
    %27 = vector.broadcast %cst_7 : f32 to vector<8x1xf32>
    %28 = arith.subf %27, %26 : vector<8x1xf32>
    %cst_8 = arith.constant 0.000000e+00 : f32
    %29 = vector.broadcast %cst_8 : f32 to vector<8x1xf32>
    %30 = arith.maximumf %28, %29 : vector<8x1xf32>
    %31 = arith.mulf %30, %30 : vector<8x1xf32>
    %cst_9 = arith.constant 1.000000e+00 : f32
    %32 = vector.broadcast %cst_9 : f32 to vector<8x1xf32>
    %33 = arith.mulf %32, %31 : vector<8x1xf32>
    %34 = arith.mulf %33, %23 : vector<8x1xf32>
    %cst_10 = arith.constant 0.000000e+00 : f32
    %35 = vector.broadcast %cst_10 : f32 to vector<8x1xf32>
    %36 = arith.select %7, %34, %35 : vector<8x1xi1>, vector<8x1xf32>
    %37 = vector.shape_cast %36 : vector<8x1xf32> to vector<1x8x1xf32>
    %cst_11 = arith.constant dense<0.000000e+00> : vector<1xf32>
    %38 = vector.multi_reduction <add>, %37, %cst_11 [1, 2] : vector<1x8x1xf32> to vector<1xf32>
    %39 = vector.shape_cast %38 : vector<1xf32> to vector<1x1x1xf32>
    %40 = vector.extract %39[0, 0, 0] : f32 from vector<1x1x1xf32>
    %41 = tpu.iota {dimensions = array<i32: 1>} : vector<1x8x128xi32>
    %42 = tpu.iota {dimensions = array<i32: 2>} : vector<1x8x128xi32>
    %c0_i32 = arith.constant 0 : i32
    %43 = vector.broadcast %c0_i32 : i32 to vector<1x8x128xi32>
    %44 = arith.cmpi eq, %41, %43 : vector<1x8x128xi32>
    %c0_i32_12 = arith.constant 0 : i32
    %45 = vector.broadcast %c0_i32_12 : i32 to vector<1x8x128xi32>
    %46 = arith.cmpi eq, %42, %45 : vector<1x8x128xi32>
    %47 = arith.andi %44, %46 : vector<1x8x128xi1>
    %cst_13 = arith.constant 0.000000e+00 : f32
    %48 = vector.broadcast %40 : f32 to vector<1x8x128xf32>
    %49 = vector.broadcast %cst_13 : f32 to vector<1x8x128xf32>
    %50 = arith.select %47, %48, %49 : vector<1x8x128xi1>, vector<1x8x128xf32>
    %c0_14 = arith.constant 0 : index
    %c0_15 = arith.constant 0 : index
    %c0_16 = arith.constant 0 : index
    %51 = vector.load %arg3[%c0_14, %c0_15, %c0_16] : memref<1x8x128xf32, #tpu.memory_space<vmem>>, vector<1x8x128xf32>
    tpu.vector_store %arg3[%c0_14, %c0_15, %c0_16], %50 {strides = array<i32>} : memref<1x8x128xf32, #tpu.memory_space<vmem>>, vector<1x8x128xf32>,
    return
  }
  func.func @transform_0(%arg0: i32) -> (i32, i32) {
    %c0_i32 = arith.constant 0 : i32
    %c0_i32_0 = arith.constant 0 : i32
    return %arg0, %c0_i32 : i32, i32
  }
  func.func @transform_1(%arg0: i32) -> (i32, i32) {
    %c0_i32 = arith.constant 0 : i32
    %c0_i32_0 = arith.constant 0 : i32
    return %arg0, %c0_i32 : i32, i32
  }
  func.func @transform_2(%arg0: i32) -> (i32, i32, i32) {
    %c0_i32 = arith.constant 0 : i32
    %c0_i32_0 = arith.constant 0 : i32
    %c0_i32_1 = arith.constant 0 : i32
    return %arg0, %c0_i32, %c0_i32_0 : i32, i32, i32
  }
}

</mosaic_0001>

<bundles_post_ra>
// kernel: tpu_custom_call.1
= control target key start
LH: loop header
LB: loop body
LE: loop exit
PB: predicated region body
PF: predicated region fallthrough
CT: control target
= control target key end

     0   :  { %vm20_vm0 = vcmask 261120   ;;  %s158_s0 = inlined_call_operand.vmem [shape: f32[8,32], index: 0, kind: input, shape index: {}]   ;;  %s159_s1 = inlined_call_operand.vmem [shape: s32[8,1], index: 1, kind: input, shape index: {}]   ;;  %s160_s2 = inlined_call_operand.hbm [shape: f32[1,8,128], index: 2, kind: output, shape index: {}]  }
   0x1   :  { %v12_v0 = vld [vmem:[%s158_s0] sm:$0xff] }
   0x2   :  { %7 = vsyncpa [#allocation3], 0  ;;  %v21_v1 = vsel %vm20_vm0, %v12_v0, -inf  ;;  %v120_v2 = vmov 0   ;;  %v13_v3 = vld [vmem:[%s159_s1] sm:$0xff]  ;;  %v14_v6 = vlaneseq  ;;  %vm52_vm2 = vcmask 7168  }
   0x3   :  { %87 = vset.pattern.permute.xlu0 %v120_v2  ;;  %s121_s0 = smov [#allocation2]  }
   0x4   :  { %22 = vmax.xlane.f32.xlu0 %v21_v1  ;;  %v31_v8 = vand.u32 127, %v14_v6  ;;  %v15_v35 = vshrl.u32 %v14_v6, 7  ;;  %s75_s1 = sshll.u32 %s121_s0, 4  ;;  %s76_s1 = int_to_ptr.vmem [resolvable:$true] %s75_s1 }
   0x5   :  { %s96_s14 = scalar_lea.vmem %s76_s1, 128  ;;  %p101_p1 = scmp.lt.s32.totalorder %s76_s1, %s76_s1 }
   0x6   :  { %vm63_vm3 = vcmp.eq.s32.totalorder %v15_v35, 0  ;;  %vm64_vm4 = vcmp.eq.s32.totalorder %v31_v8, 0  ;;  %p97_p0 = scmp.ne.s32.totalorder %s76_s1, %s96_s14  ;;  %p102_p2 = scmp.lt.s32.totalorder %s96_s14, %s96_s14 }
   0x7   :  { %vm65_vm5 = vmand %vm63_vm3, %vm64_vm4 }
   0x8   :  { %p103_p3 = por %p102_p2, %p101_p1 }
   0xa   :  { %p104_p4 = pnand %p103_p3, %p97_p0 }
  0x1a   :  { %33 = vperm.xlu0 %87, %v13_v3  }
  0x91   :  { %v23_v4 = vpop.xlane.xlu0 %22 }
  0x92   :  { %v24_v5 = vsub.f32 %v12_v0, %v23_v4 }
  0x94   :  { %v25_v7 = vmul.f32 1.442695, %v24_v5 }
  0x96   :  { %88 = vpow2.f32 %v25_v7 }
  0x99   :  { %v34_v9 = vpop.permute.xlu0 %33 }
  0x9a   :  { %vm35_vm1 = vcmp.eq.s32.totalorder %v31_v8, %v34_v9 }
  0x9b   :  { %v36_v10 = vsel %vm35_vm1, %v24_v5, 0.0 }
  0x9c   :  { %v37_v11 = vsel %vm20_vm0, %v36_v10, 0.0 }
  0x9d   :  { %38 = vadd.xlane.f32.xlu1 %v37_v11 }
  0xa0   :  { %v89_v12 = vpop.eup %88 }
  0xa1   :  { %v27_v13 = vsel %vm20_vm0, %v89_v12, 0.0 }
  0xa2   :  { %28 = vadd.xlane.f32.xlu1 %v27_v13 }
 0x12a   :  { %v39_v14 = vpop.xlane.xlu1 %38 }
 0x12b   :  { %v43_v15 = vmul.f32 1.442695, %v39_v14 }
 0x12d   :  { %90 = vpow2.f32 %v43_v15 }
 0x12f   :  { %v29_v16 = vpop.xlane.xlu1 %28 }
 0x130   :  { %92 = vlog2.f32 %v29_v16 }
 0x131   :  { %94 = vrcp.f32 %v29_v16 }
 0x137   :  { %v91_v17 = vpop.eup %90 }
 0x13a   :  { %v93_v18 = vpop.eup %92 }
 0x13b   :  { %v95_v19 = vpop.eup %94  ;;  %v41_v21 = vmul.f32 0.6931472, %v93_v18 }
 0x13c   :  { %v46_v20 = vmul.f32 %v95_v19, %v91_v17 }
 0x13d   :  { %v42_v24 = vsub.f32 %v41_v21, %v39_v14 }
 0x13e   :  { %v47_v22 = vsub.f32 1.0, %v46_v20 }
 0x140   :  { %v48_v23 = vmax.f32 %v47_v22, 0.0 }
 0x142   :  { %v49_v25 = vmul.f32 %v48_v23, %v48_v23 }
 0x144   :  { %v50_v26 = vmul.f32 %v49_v25, %v42_v24 }
 0x146   :  { %v53_v27 = vsel %vm52_vm2, %v50_v26, 0.0 }
 0x147   :  { %54 = vadd.xlane.f32.xlu1 %v53_v27 }
 0x1d4   :  { %v55_v28 = vpop.xlane.xlu1 %54 }
 0x1d5   :  { %v56_v29 = vrot.slane %v55_v28, 4 }
 0x1d7   :  { %v57_v30 = vadd.f32 %v56_v29, %v55_v28 }
 0x1d9   :  { %v58_v31 = vrot.slane %v57_v30, 2 }
 0x1db   :  { %v59_v32 = vadd.f32 %v58_v31, %v57_v30 }
 0x1dd   :  { %v60_v33 = vrot.slane %v59_v32, 1 }
 0x1df   :  { %v61_v34 = vadd.f32 %v60_v33, %v59_v32 }
 0x1e1   :  { %83 = vpush %v61_v34 }
 0x212   :  { %s84_s13 = spop %83 }
 0x213   :  { %v66_v36 = vstv %s84_s13 }
 0x214   :  { %v67_v37 = vsel %vm65_vm5, %v66_v36, 0.0 }
 0x215   :  { %68 = vst [vmem:[#allocation2] sm:$0xff] %v67_v37 }
 0x216   :  { %107 = shalt.err (!%p104_p4)
}
 0x217   :  { %s108_s17 = scalar_lea.hbm %s160_s2, 128 }
 0x218   :  { %p109_p5 = scmp.ne.s32.totalorder %s160_s2, %s108_s17  ;;  %p112_p6 = scmp.lt.u32.totalorder %s108_s17, %s160_s2 }
 0x21a   :  { %p114_p7 = pnand %p112_p6, %p109_p5 }
 0x21c   :  { %117 = shalt.err (!%p114_p7)
}
 0x21d   :  { %78 = dma.vmem_to_hbm [thread:$0]  %s76_s1, 128, %s160_s2, [#allocation3]  }
 0x21e   :  { %118 = dma.done.wait [#allocation3], 128  }
 0x21f   :  { %119 = vsyncadd [#allocation3], 4294967168 }
 0x220   :  { %82 = vsyncpa [#allocation3], 1 }

</bundles_post_ra>
